<compile_context>
chip_gen: v7x
topology: tpu7x:2x2x1
jax: 0.10.0
libtpu: 0.0.40
codegen_flags: <defaults>
</compile_context>

<pallas_src>
import functools

import jax
import jax.numpy as jnp
import numpy as np
from jax.experimental import pallas as pl
from jax.experimental.pallas import tpu as pltpu


def _pick_block_b(batch, n_tokens, cpp, dtype_bytes, *,
                  target_block_bytes=4 << 20, sublane=16):
    """Largest divisor of `batch` whose patches block stays <= target bytes
    (multi-MiB blocks amortize the ~0.35us/step overhead), keeping >= 2 grid
    steps when possible and preferring block_b*N aligned to sublane packing."""
    cands = []
    for d in range(1, batch + 1):
        if batch % d:
            continue
        if batch >= 2 and batch // d < 2:
            continue                     # keep >= 2 grid steps (v7x megacore)
        if d > 1 and d * n_tokens * cpp * dtype_bytes > target_block_bytes:
            continue
        cands.append(d)
    if not cands:
        return 1
    # prefer sublane-aligned m = block_b*N, then the largest block.
    return max(cands, key=lambda d: (((d * n_tokens) % sublane) == 0, d))


def _grouper_kernel(patches_ref, wf_ref, bf_ref, out_ref):
    """Per-grid-step kernel (single fused matmul + f32 softmax).

    patches_ref : (block_b, N, CPP)  flattened image patches (compute dtype)
    wf_ref      : (CPP, G)           fused weight  Wpe @ Wq^T @ k^T * scale
    bf_ref      : (N, G)   f32       fused bias    (pos + conv_b) @ Wq^T @ k^T * scale
    out_ref     : (block_b, G, N)    segment probabilities (token axis on lanes)
    """
    block_b, n, cpp = patches_ref.shape
    g = wf_ref.shape[1]
    m = block_b * n

    # Fold the batch block into MXU rows (free view when m is sublane-aligned).
    patches = patches_ref[...].reshape(m, cpp)

    # Single fused matmul; f32 accumulation.
    attn = jnp.dot(patches, wf_ref[...], preferred_element_type=jnp.float32)
    attn = attn.reshape(block_b, n, g) + bf_ref[...][None]        # + fused bias

    # Softmax over groups, in f32; divide goes to the EUP (approx reciprocal).
    attn = attn - jnp.max(attn, axis=-1, keepdims=True)
    e = jnp.exp(attn)
    probs = e * pl.reciprocal(jnp.sum(e, axis=-1, keepdims=True), approx=True)

    # Store with the token axis on lanes: (block_b, G, N).
    out_ref[...] = jnp.swapaxes(probs, 1, 2).astype(out_ref.dtype)


def patch_grouper_forward(imgs, params, *, patch_size, num_groups,
                          compute_dtype=jnp.bfloat16, block_b=None):
    """imgs: (B, C, H, W) float32 (NCHW). Returns (B, N, num_groups) float32."""
    B, C, H, W = imgs.shape
    p = patch_size
    Hp, Wp = H // p, W // p
    N = Hp * Wp
    D = params["pos_embed"].shape[-1]
    CPP = C * p * p
    G = num_groups

    dtype_bytes = np.dtype(compute_dtype).itemsize
    sublane = 16 if dtype_bytes < 4 else 8
    if block_b is None:
        block_b = _pick_block_b(B, N, CPP, dtype_bytes, sublane=sublane)
    assert B % block_b == 0

    # --- glue: extract non-overlapping patches, row-major over (Hp, Wp).
    # Materialized once contiguously so the Pallas input DMA streams
    # contiguous (block_b, N, CPP) rows (no strided fused DMA).
    patches = imgs.reshape(B, C, Hp, p, Wp, p)
    patches = patches.transpose(0, 2, 4, 1, 3, 5).reshape(B, N, CPP)
    patches = patches.astype(compute_dtype)

    # --- algebraic fold, done in f32 to avoid compounding rounding in the
    # precomputed weight; only the final fused weight is cast to compute_dtype.
    f32 = jnp.float32
    wpe = params["proj_w"].reshape(D, CPP).T.astype(f32)               # (CPP, D)
    posb = (params["pos_embed"].reshape(N, D)
            + params["proj_b"].reshape(1, D)).astype(f32)              # (N, D)
    k = params["group_tokens"].reshape(G, D).astype(f32) @ \
        params["k_w"].T.astype(f32)                                     # (G, D)
    scale = float(D) ** (-0.5)
    chain = (params["q_w"].T.astype(f32) @ k.T) * scale                 # (D, G)
    w_fused = (wpe @ chain).astype(compute_dtype)                       # (CPP, G)
    b_fused = (posb @ chain).astype(f32)                                # (N, G)

    # VMEM budget: double-buffered patches block + tiny constant operands +
    # double-buffered output.  Raise the scoped limit above the v5e 16 MiB
    # default but stay well under v7x's 64 MiB physical VMEM.
    vmem_need = (2 * block_b * N * CPP * dtype_bytes        # patches (x2 buf)
                 + CPP * G * dtype_bytes + N * G * 4        # fused weight/bias
                 + 2 * block_b * G * N * 4)                 # output (x2 buf)
    vmem_limit = int(min(max(2 * vmem_need + (4 << 20), 32 << 20), 48 << 20))

    grid_spec = pltpu.PrefetchScalarGridSpec(
        num_scalar_prefetch=0,
        grid=(B // block_b,),
        in_specs=[
            pl.BlockSpec((block_b, N, CPP), lambda b: (b, 0, 0)),
            pl.BlockSpec((CPP, G), lambda b: (0, 0)),
            pl.BlockSpec((N, G), lambda b: (0, 0)),
        ],
        out_specs=pl.BlockSpec((block_b, G, N), lambda b: (b, 0, 0)),
    )

    out_bgn = pl.pallas_call(
        _grouper_kernel,
        out_shape=jax.ShapeDtypeStruct((B, G, N), jnp.float32),
        grid_spec=grid_spec,
        compiler_params=pltpu.CompilerParams(
            dimension_semantics=("parallel",),
            vmem_limit_bytes=vmem_limit,
        ),
    )(patches, w_fused, b_fused)

    # Back to the module's (B, N, G) layout (tiny tensor, one cheap transpose).
    return jnp.transpose(out_bgn, (0, 2, 1))


def _reference_forward(imgs, params, *, patch_size, num_groups):
    """Pure-JAX f32 reference mirroring the PyTorch forward (debug_mode path)."""
    B, C, H, W = imgs.shape
    p = patch_size
    Hp, Wp = H // p, W // p
    N = Hp * Wp
    D = params["pos_embed"].shape[-1]
    patches = imgs.reshape(B, C, Hp, p, Wp, p).transpose(0, 2, 4, 1, 3, 5)
    patches = patches.reshape(B, N, C * p * p)
    x = patches @ params["proj_w"].reshape(D, -1).T + params["proj_b"]
    x = x + params["pos_embed"]                                   # (B, N, D)
    g = jnp.broadcast_to(params["group_tokens"].reshape(1, num_groups, D),
                         (B, num_groups, D))
    q = x @ params["q_w"].T                                       # (B, N, D)
    k = g @ params["k_w"].T                                       # (B, G, D)
    attn = jnp.einsum("bnd,bgd->bng", q, k) * (float(D) ** -0.5)
    return jax.nn.softmax(attn, axis=-1)


if __name__ == "__main__":
    # Small shapes consistent with the module: img 16x16, patch 4, 4 channels,
    # embed_dim 32, 2 group tokens -> 16 patch tokens per image.
    B, C, IMG, P, D, G = 2, 4, 16, 4, 32, 2
    N = (IMG // P) ** 2

    key = jax.random.PRNGKey(0)
    k_img, k_pw, k_pb, k_pos, k_gt, k_q, k_k = jax.random.split(key, 7)

    imgs = jax.random.normal(k_img, (B, C, IMG, IMG), dtype=jnp.float32)

    params = {
        "proj_w": jax.random.normal(k_pw, (D, C, P, P), jnp.float32) * 0.05,
        "proj_b": jax.random.normal(k_pb, (D,), jnp.float32) * 0.02,
        "pos_embed": jax.random.normal(k_pos, (1, N, D), jnp.float32) * 0.02,
        "group_tokens": jax.random.normal(k_gt, (G, 1, D), jnp.float32) * 0.02,
        "q_w": jax.random.normal(k_q, (D, D), jnp.float32) * 0.05,
        "k_w": jax.random.normal(k_k, (D, D), jnp.float32) * 0.05,
    }

    ref = jax.block_until_ready(
        _reference_forward(imgs, params, patch_size=P, num_groups=G))

    # Default path: bf16 patches / fused weight (full-rate MXU on v5e/v6e/v7x),
    # f32 accumulation + softmax.
    fwd_bf16 = jax.jit(functools.partial(
        patch_grouper_forward, patch_size=P, num_groups=G,
        compute_dtype=jnp.bfloat16))
    out = jax.block_until_ready(fwd_bf16(imgs, params))
    assert out.shape == (B, N, G), out.shape
    np.testing.assert_allclose(np.asarray(out, dtype=np.float32),
                               np.asarray(ref), rtol=2e-2, atol=2e-2)

    # Optional full-f32 path (halved HBM savings given up; numerics-check only).
    fwd_f32 = jax.jit(functools.partial(
        patch_grouper_forward, patch_size=P, num_groups=G,
        compute_dtype=jnp.float32))
    out32 = jax.block_until_ready(fwd_f32(imgs, params))
    np.testing.assert_allclose(np.asarray(out32), np.asarray(ref),
                               rtol=5e-3, atol=5e-3)

    print("KERNEL_OK")
</pallas_src>

<mosaic_0001>
module attributes {stable_mosaic.version = 11 : i64} {
  func.func @_grouper_kernel(%arg0: i32, %arg1: memref<1x16x64xbf16, #tpu.memory_space<vmem>>, %arg2: memref<64x2xbf16, #tpu.memory_space<vmem>>, %arg3: memref<16x2xf32, #tpu.memory_space<vmem>>, %arg4: memref<1x2x16xf32, #tpu.memory_space<vmem>>) attributes {dimension_semantics = [#tpu.dimension_semantics<parallel>], iteration_bounds = array<i64: 2>, scalar_prefetch = 0 : i64, scratch_operands = 0 : i64, tpu.core_type = #tpu.core_type<tc>, window_params = [{transform_indices = @transform_0, window_bounds = array<i64: 1, 16, 64>}, {pipeline_mode = #tpu.pipeline_mode<synchronous>, transform_indices = @transform_1, window_bounds = array<i64: 64, 2>}, {pipeline_mode = #tpu.pipeline_mode<synchronous>, transform_indices = @transform_2, window_bounds = array<i64: 16, 2>}, {transform_indices = @transform_3, window_bounds = array<i64: 1, 2, 16>}]} {
    %c0 = arith.constant 0 : index
    %c0_0 = arith.constant 0 : index
    %c0_1 = arith.constant 0 : index
    %0 = vector.load %arg1[%c0, %c0_0, %c0_1] : memref<1x16x64xbf16, #tpu.memory_space<vmem>>, vector<1x16x64xbf16>
    %1 = vector.shape_cast %0 : vector<1x16x64xbf16> to vector<16x64xbf16>
    %c0_2 = arith.constant 0 : index
    %c0_3 = arith.constant 0 : index
    %2 = vector.load %arg2[%c0_2, %c0_3] : memref<64x2xbf16, #tpu.memory_space<vmem>>, vector<64x2xbf16>
    %cst = arith.constant dense<0.000000e+00> : vector<16x2xf32>
    %3 = tpu.matmul %1, %2, %cst {dimension_numbers = #tpu.dot_dimension_numbers<[1], [0], [0], [1], [0, 0, 1, 1], [], []>} : vector<16x64xbf16>, vector<64x2xbf16>, vector<16x2xf32> -> vector<16x2xf32>
    %4 = vector.shape_cast %3 : vector<16x2xf32> to vector<1x16x2xf32>
    %c0_4 = arith.constant 0 : index
    %c0_5 = arith.constant 0 : index
    %5 = vector.load %arg3[%c0_4, %c0_5] : memref<16x2xf32, #tpu.memory_space<vmem>>, vector<16x2xf32>
    %6 = vector.shape_cast %5 : vector<16x2xf32> to vector<1x16x2xf32>
    %7 = arith.addf %4, %6 : vector<1x16x2xf32>
    %cst_6 = arith.constant dense<0xFF800000> : vector<1x16xf32>
    %8 = vector.multi_reduction <maximumf>, %7, %cst_6 [2] : vector<1x16x2xf32> to vector<1x16xf32>
    %9 = vector.shape_cast %8 : vector<1x16xf32> to vector<1x16x1xf32>
    %10 = vector.broadcast %9 : vector<1x16x1xf32> to vector<1x16x2xf32>
    %11 = arith.subf %7, %10 : vector<1x16x2xf32>
    %12 = math.exp %11 : vector<1x16x2xf32>
    %cst_7 = arith.constant dense<0.000000e+00> : vector<1x16xf32>
    %13 = vector.multi_reduction <add>, %12, %cst_7 [2] : vector<1x16x2xf32> to vector<1x16xf32>
    %14 = vector.shape_cast %13 : vector<1x16xf32> to vector<1x16x1xf32>
    %15 = tpu.reciprocal %14 {approx = true} : vector<1x16x1xf32> -> vector<1x16x1xf32>
    %16 = vector.broadcast %15 : vector<1x16x1xf32> to vector<1x16x2xf32>
    %17 = arith.mulf %12, %16 : vector<1x16x2xf32>
    %18 = tpu.transpose %17, [0, 2, 1] : vector<1x16x2xf32> -> vector<1x2x16xf32>
    %c0_8 = arith.constant 0 : index
    %c0_9 = arith.constant 0 : index
    %c0_10 = arith.constant 0 : index
    %19 = vector.load %arg4[%c0_8, %c0_9, %c0_10] : memref<1x2x16xf32, #tpu.memory_space<vmem>>, vector<1x2x16xf32>
    tpu.vector_store %arg4[%c0_8, %c0_9, %c0_10], %18 {strides = array<i32>} : memref<1x2x16xf32, #tpu.memory_space<vmem>>, vector<1x2x16xf32>,
    return
  }
  func.func @transform_0(%arg0: i32) -> (i32, i32, i32) {
    %c0_i32 = arith.constant 0 : i32
    %c0_i32_0 = arith.constant 0 : i32
    %c0_i32_1 = arith.constant 0 : i32
    return %arg0, %c0_i32, %c0_i32_0 : i32, i32, i32
  }
  func.func @transform_1(%arg0: i32) -> (i32, i32) {
    %c0_i32 = arith.constant 0 : i32
    %c0_i32_0 = arith.constant 0 : i32
    %c0_i32_1 = arith.constant 0 : i32
    return %c0_i32, %c0_i32_0 : i32, i32
  }
  func.func @transform_2(%arg0: i32) -> (i32, i32) {
    %c0_i32 = arith.constant 0 : i32
    %c0_i32_0 = arith.constant 0 : i32
    %c0_i32_1 = arith.constant 0 : i32
    return %c0_i32, %c0_i32_0 : i32, i32
  }
  func.func @transform_3(%arg0: i32) -> (i32, i32, i32) {
    %c0_i32 = arith.constant 0 : i32
    %c0_i32_0 = arith.constant 0 : i32
    %c0_i32_1 = arith.constant 0 : i32
    return %arg0, %c0_i32, %c0_i32_0 : i32, i32, i32
  }
}

</mosaic_0001>

<bundles_post_ra>
// kernel: patch_grouper_forward.1
= control target key start
LH: loop header
LB: loop body
LE: loop exit
PB: predicated region body
PF: predicated region fallthrough
CT: control target
= control target key end

     0   :  { %8 = vsyncpa [#allocation3], 0  ;;  %s686_s0 = inlined_call_operand.vmem [shape: bf16[2,16,64], index: 0, kind: input, shape index: {}]   ;;  %s687_s1 = inlined_call_operand.vmem [shape: bf16[64,2], index: 1, kind: input, shape index: {}]   ;;  %s688_s2 = inlined_call_operand.vmem [shape: f32[16,2], index: 2, kind: input, shape index: {}]   ;;  %s689_s3 = inlined_call_operand.hbm [shape: f32[2,2,16], index: 3, kind: output, shape index: {}]  }
   0x1   :  { %10 = vsyncpa [#allocation3 + $0x1], 0  ;;  %s564_s12 = smov 0   ;;  %s566_s13 = smov 0  }
   0x2   :  { %s568_s14 = smov 0   ;;  %s570_s15 = smov 0  }
   0x3 LB: > { %s585_s16 = sadd.s32 4294967295, %s539_s15   ;;  %s388_s17 = sadd.s32 4294967294, %s539_s15   ;;  %s539_s15 = sphi %s570_s15, %s695_s15   ;;  %s535_s14 = sphi %s568_s14, %s694_s14   ;;  %s531_s13 = sphi %s566_s13, %s693_s13   ;;  %s527_s12 = sphi %s564_s12, %s692_s12  }
   0x4   : > { %s589_s18 = sadd.s32 1, %s539_s15   ;;  %s91_s19 = sadd.s32 1, %s535_s14 }
   0x5   : > { %s88_s20 = ssub.s32 %s539_s15, %s589_s18  ;;  %p101_p0 = scmp.ne.s32.totalorder %s535_s14, %s531_s13 }
   0x6   : > { %p89_p1 = scmp.eq.s32.totalorder %s88_s20, 0  ;;  %p102_p2 = scmp.eq.s32.totalorder %s585_s16, 1 }
   0x7   : > { %p107_p3 = scmp.ne.s32.totalorder %s531_s13, %s527_s12  ;;  %p108_p4 = scmp.eq.s32.totalorder %s388_s17, 1 }
   0x8   : > { %s600_s21 = scalar_select %p89_p1, %s535_s14, %s91_s19  }
   0x9   : > { %p602_p5 = por %p102_p2, %p101_p0  ;;  %p606_p6 = por %p108_p4, %p107_p3 }
   0xa   : > { %p391_p7 = scmp.ge.s32.totalorder %s539_s15, 1  ;;  %p140_p8 = scmp.lt.s32.totalorder %s539_s15, 3 }
   0xc   : > { %p141_p9 = pnand %p391_p7, %p140_p8 }
   0xd   : > { %v464_v0 = vld [vmem:[%s687_s1] sm:$0xff] (!%p141_p9)   ;;  %v541_v1 = vmov (!%p141_p9), 0.0   ;;  %v465_v2 = vld [vmem:[%s687_s1 + $0x8] sm:$0xff] (!%p141_p9)   ;;  %vm542_vm0 = vmmov (!%p141_p9), 0   ;;  %p164_p10 = scmp.lt.s32.totalorder (!%p141_p9), %s585_s16, 1  ;;  %v466_v3 = vld [vmem:[%s687_s1 + $0x10] sm:$0xff] (!%p141_p9)  }
   0xe   : > { %144 = sbr.rel (%p141_p9) target bundleno = 701 (0x2bd), region = 32  ;;  %411 = vmatprep.subr.bf16.mxu0 (!%p141_p9), %v541_v1  ;;  %419 = vmatprep.mubr.msk.bf16.mxu0 (!%p141_p9), %vm542_vm0, %v541_v1  ;;  %v467_v4 = vld [vmem:[%s687_s1 + $0x18] sm:$0xff] (!%p141_p9)   ;;  %vm209_vm1 = vcmask (!%p141_p9), 523264   ;;  %v254_v6 = vld [vmem:[%s688_s2] sm:$0xff] (!%p141_p9)  ;;  %v255_v8 = vld [vmem:[%s688_s2 + $0x8] sm:$0xff] (!%p141_p9)  ;;  %vm258_vm2 = vcmask (!%p141_p9), 15360  }
   0xf   : > { %412 = vmatpush3.bf16.msra.mxu0 (!%p141_p9), %v464_v0  ;;  %s161_s20 = sand.u32 (!%p141_p9), 1, %s531_s13   ;;  %s402_s25 = sshll.u32 (!%p141_p9), %s585_s16, 5  ;;  %vm313_vm3 = vcmask (!%p141_p9), 123904  }
  0x10   : > { %413 = vmatprep.subr.bf16.mxu0 (!%p141_p9), %v541_v1  ;;  %s392_s24 = sshll.u32 (!%p141_p9), %s161_s20, 1  ;;  %s644_s30 = scalar_lea.hbm (!%p141_p9), %s689_s3, %s402_s25 }
  0x11   : > { %s163_s26 = scalar_lea.vmem (!%p141_p9), [#allocation2], %s392_s24 }
  0x12   : > { %s329_s27 = sshll.u32 (!%p141_p9), %s163_s26, 4  ;;  %s646_s27 = int_to_ptr.vmem [resolvable:$true] %s329_s27 }
  0x13   : > { %414 = vmatpush3.bf16.msra.mxu0 (!%p141_p9), %v465_v2  ;;  %s477_s5 = scalar_lea.vmem (!%p141_p9), %s646_s27, 32 }
  0x14   : > { %415 = vmatprep.subr.bf16.mxu0 (!%p141_p9), %v541_v1  ;;  %p478_p11 = scmp.ne.s32.totalorder (!%p141_p9), %s646_s27, %s477_s5 }
  0x15   : > { %s165_s28 = scalar_select %p164_p10, %s585_s16, 1 }
  0x16   : > { %p479_p12 = pnand %p478_p11, %p602_p5  ;;  %s543_s16 = smov [#allocation2]  }
  0x17   : > { %s405_s4 = sshll.u32 %s165_s28, 3  ;;  %416 = vmatpush3.bf16.msra.mxu0 %v466_v3  ;;  %s481_s6 = sshll.u32 %s543_s16, 4  ;;  %s482_s6 = int_to_ptr.vmem [resolvable:$false] %s481_s6 }
  0x18   : > { %s168_s7 = scalar_lea.vmem %s686_s0, %s405_s4  ;;  %417 = vmatprep.subr.bf16.mxu0 %v541_v1  ;;  %s316_s4 = scalar_lea.sflag [#allocation3], %s161_s20 }
  0x19   : > { %v468_v5 = vld [vmem:[%s168_s7] sm:$0xff]   ;;  %p480_p13 = pneg %p479_p12  ;;  %s483_s7 = scalar_lea.vmem %s482_s6, 64 }
  0x1a   : > { %p484_p0 = scmp.lt.s32.totalorder %s646_s27, %s482_s6  ;;  %p485_p1 = scmp.lt.s32.totalorder %s483_s7, %s477_s5 }
  0x1b   : > { %418 = vmatpush3.bf16.msra.mxu0 %v467_v4 }
  0x1c   : > { %p486_p2 = por %p485_p1, %p484_p0 }
  0x1e   : > { %420 = vmatmul.mubr.msk.bf16.vlgmr.msra.gmra.mrb[0].mxu0 %vm209_vm1, %v468_v5  ;;  %p487_p3 = pnand %p486_p2, %p480_p13 }
  0xf1   : > { %v247_v7 = vpop.f32.mrb[0].mxu0 }
  0xf2   : > { %v256_v9 = vadd.f32 %v254_v6, %v247_v7  ;;  %v421_v10 = vpop.f32.mrb[1].mxu0 }
  0xf3   : > { %v250_v11 = vpop.f32.mrb[2].mxu0 }
  0xf4   : > { %v257_v12 = vadd.f32 %v255_v8, %v250_v11  ;;  %v422_v13 = vpop.f32.mrb[3].mxu0  ;;  %v259_v14 = vsel %vm258_vm2, %v256_v9, -inf }
  0xf5   : > { %260 = vmax.xlane.f32.xlu0 %v259_v14 }
  0xf6   : > { %v262_v15 = vsel %vm258_vm2, %v257_v12, -inf }
  0xf9   : > { %263 = vmax.xlane.f32.xlu0 %v262_v15 }
 0x182   : > { %v261_v16 = vpop.xlane.xlu0 %260 }
 0x183   : > { %v265_v17 = vsub.f32 %v256_v9, %v261_v16 }
 0x185   : > { %v267_v18 = vmul.f32 1.442695, %v265_v17 }
 0x186   : > { %v264_v19 = vpop.xlane.xlu0 %263 }
 0x187   : > { %469 = vpow2.f32 %v267_v18  ;;  %v266_v20 = vsub.f32 %v257_v12, %v264_v19 }
 0x189   : > { %v269_v21 = vmul.f32 1.442695, %v266_v20 }
 0x18b   : > { %471 = vpow2.f32 %v269_v21 }
 0x191   : > { %v470_v22 = vpop.eup %469 }
 0x192   : > { %v271_v23 = vsel %vm258_vm2, %v470_v22, 0.0 }
 0x193   : > { %272 = vadd.xlane.f32.xlu1 %v271_v23 }
 0x195   : > { %v472_v24 = vpop.eup %471 }
 0x196   : > { %v274_v25 = vsel %vm258_vm2, %v472_v24, 0.0 }
 0x197   : > { %275 = vadd.xlane.f32.xlu1 %v274_v25 }
 0x220   : > { %v273_v26 = vpop.xlane.xlu1 %272 }
 0x221   : > { %473 = vrcp.f32 %v273_v26 }
 0x224   : > { %v276_v27 = vpop.xlane.xlu1 %275 }
 0x225   : > { %475 = vrcp.f32 %v276_v27 }
 0x22b   : > { %v474_v28 = vpop.eup %473 }
 0x22c   : > { %v279_v29 = vmul.f32 %v474_v28, %v470_v22 }
 0x22e   : > { %281 = vxpose.xlu0.b32.start [1/2] (short) (narrow) %v279_v29, 8 }
 0x22f   : > { %v476_v30 = vpop.eup %475 }
 0x230   : > { %v280_v31 = vmul.f32 %v476_v30, %v472_v24 }
 0x232   : > { %282 = vxpose.xlu0.b32.end [2/2] (short) (narrow) %v280_v31, 8 }
 0x2ae   : > { %v297_v32 = vpop.trf.xlu0 }
 0x2af   : > { %314 = vst.msk [vmem:[%s163_s26] sm:$0x3] %vm313_vm3, %v297_v32 }
 0x2b0   : > { %490 = shalt.err (!%p487_p3)
}
 0x2b1   : > { %s491_s8 = scalar_lea.hbm %s644_s30, 32  ;;  %s495_s11 = scalar_lea.hbm %s689_s3, 64 }
 0x2b2   : > { %p492_p4 = scmp.ne.s32.totalorder %s644_s30, %s491_s8  ;;  %p496_p9 = scmp.lt.u32.totalorder %s644_s30, %s689_s3 }
 0x2b3   : > { %p497_p10 = scmp.lt.u32.totalorder %s495_s11, %s491_s8  ;;  %p499_p12 = scmp.lt.u32.totalorder %s491_s8, %s644_s30 }
 0x2b4   : > { %p493_p7 = pnand %p492_p4, %p602_p5 }
 0x2b5   : > { %p498_p11 = por %p497_p10, %p496_p9 }
 0x2b6   : > { %p494_p8 = pneg %p493_p7 }
 0x2b7   : > { %p500_p13 = por %p499_p12, %p498_p11 }
 0x2b9   : > { %p501_p0 = pnand %p500_p13, %p494_p8 }
 0x2bb   : > { %504 = shalt.err (!%p501_p0)
}
 0x2bc   : > { %423 = dma.vmem_to_hbm [thread:$0]  (%p602_p5), %s646_s27, 32, %s644_s30, %s316_s4  }
 0x2bd PF: > { %p429_p1 = scmp.ge.s32.totalorder %s539_s15, 2  ;;  %s341_s20 = sand.u32 1, %s527_s12  }
 0x2be   : > { %s342_s24 = scalar_lea.sflag [#allocation3], %s341_s20 }
 0x2bf   : > { %p426_p2 = pnand %p429_p1, %p606_p6 }
 0x2c1   : > { %522 = dma.done.wait (!%p426_p2), %s342_s24, 32  }
 0x2c2   : > { %524 = vsyncadd (!%p426_p2), %s342_s24, 4294967264  ;;  %p13_p3 = scmp.ge.s32.totalorder %s589_s18, 4   ;;  %s692_s12 = smov %s531_s13 }
 0x2c3   : > { %s693_s13 = smov %s535_s14  ;;  %s694_s14 = smov %s600_s21 }
 0x2c4   : > { %s695_s15 = smov %s589_s18  ;;  %15 = sbr.rel (!%p13_p3) target bundleno = 3 (0x3), region = 67 }
 0x2cb   :  { %347 = vsyncpa [#allocation3], 1 }
 0x2cc   :  { %349 = vsyncpa [#allocation3 + $0x1], 1 }

</bundles_post_ra>
